<compile_context>
chip_gen: v6e
topology: v6e:2x2x1
jax: 0.10.0
libtpu: 0.0.40
codegen_flags: <defaults>
</compile_context>

<pallas_src>
import jax
import jax.numpy as jnp
from jax.experimental import pallas as pl
from jax.experimental.pallas import tpu as pltpu

_EPSILON = 1e-6
_TARGET_BLOCK_BYTES = 4 * 1024 * 1024    # per-input per-block budget
_VMEM_LIMIT_BYTES = 32 * 1024 * 1024     # valid on v5e/v6e (128 MiB) and v7x (64 MiB)


def _round_up(x, m):
    return ((x + m - 1) // m) * m


def _iou_rows_kernel(yp_ref, yt_ref, iou_ref, inter_acc, tsq_acc, psq_acc):
    j = pl.program_id(1)                      # spatial (reduction) axis, last

    @pl.when(j == 0)
    def _():
        inter_acc[...] = jnp.zeros_like(inter_acc)
        tsq_acc[...] = jnp.zeros_like(tsq_acc)
        psq_acc[...] = jnp.zeros_like(psq_acc)

    # Load native dtype from HBM; compute + accumulate in f32 in-vreg.
    yp = jax.nn.sigmoid(yp_ref[...].astype(jnp.float32))   # (BR, BHW)
    yt = yt_ref[...].astype(jnp.float32)                    # (BR, BHW)

    inter_acc[...] += jnp.sum(yt * yp, axis=-1, keepdims=True)
    tsq_acc[...] += jnp.sum(yt * yt, axis=-1, keepdims=True)
    psq_acc[...] += jnp.sum(yp * yp, axis=-1, keepdims=True)

    @pl.when(j == pl.num_programs(1) - 1)
    def _():
        inter = inter_acc[...]
        iou_ref[...] = (inter + _EPSILON) / (
            tsq_acc[...] + psq_acc[...] - inter + _EPSILON)


def iou_loss(y_pred, y_true):
    """Pallas equivalent of IoULoss().forward(y_pred, y_true). Returns a scalar."""
    assert y_pred.shape == y_true.shape
    N, C, H, W = y_pred.shape
    R = N * C
    HW = H * W

    # Zero-cost 2D view of the contiguous NCHW arrays: rows = (n, c) pairs,
    # flattened spatial axis last (lane-dense).
    yp2 = y_pred.reshape(R, HW)
    yt2 = y_true.reshape(R, HW)

    elem_bytes = 4  # size blocks conservatively in f32 terms

    # --- Spatial blocking: keep full H*W on the lane axis if it fits the
    # budget; otherwise split into 128-multiples and pad the tail with
    # sigmoid-neutral values (sigmoid(-1e30) == 0, t == 0 -> zero contribution).
    if 8 * HW * elem_bytes <= _TARGET_BLOCK_BYTES:
        block_hw = HW
        hw_pad = HW
    else:
        block_hw = max((_TARGET_BLOCK_BYTES // (8 * elem_bytes)) // 128 * 128, 128)
        hw_pad = _round_up(HW, block_hw)
        pad = hw_pad - HW
        if pad:
            yp2 = jnp.pad(yp2, ((0, 0), (0, pad)), constant_values=-1e30)
            yt2 = jnp.pad(yt2, ((0, 0), (0, pad)), constant_values=0.0)

    # --- Row blocking: largest multiple-of-8 row count within the block budget
    # (or all rows, which needs no divisibility since it equals the full dim).
    max_rows = max((_TARGET_BLOCK_BYTES // (block_hw * elem_bytes)) // 8 * 8, 8)
    if R <= max_rows:
        block_rows = R
    else:
        block_rows = max_rows   # tail row-block handled by Pallas (masked store)

    grid = (pl.cdiv(R, block_rows), hw_pad // block_hw)

    iou = pl.pallas_call(
        _iou_rows_kernel,
        out_shape=jax.ShapeDtypeStruct((R, 1), jnp.float32),
        grid_spec=pltpu.PrefetchScalarGridSpec(
            num_scalar_prefetch=0,
            grid=grid,
            in_specs=[
                pl.BlockSpec((block_rows, block_hw), lambda i, j: (i, j)),
                pl.BlockSpec((block_rows, block_hw), lambda i, j: (i, j)),
            ],
            out_specs=pl.BlockSpec((block_rows, 1), lambda i, j: (i, 0)),
            scratch_shapes=[
                pltpu.VMEM((block_rows, 1), jnp.float32),
                pltpu.VMEM((block_rows, 1), jnp.float32),
                pltpu.VMEM((block_rows, 1), jnp.float32),
            ],
        ),
        compiler_params=pltpu.CompilerParams(
            dimension_semantics=("parallel", "arbitrary"),
            vmem_limit_bytes=_VMEM_LIMIT_BYTES,
        ),
    )(yp2, yt2)

    # Tiny final reduction in plain JAX (matches torch.mean over (N, C)).
    return 1.0 - jnp.mean(iou[:, 0])


def _iou_loss_ref(y_pred, y_true):
    """Pure-JAX reference mirroring the PyTorch module."""
    yp = jax.nn.sigmoid(y_pred.astype(jnp.float32))
    yt = y_true.astype(jnp.float32)
    op_sum = lambda x: x.sum(axis=(2, 3))
    inter = op_sum(yt * yp)
    iou = (inter + _EPSILON) / (op_sum(yt ** 2) + op_sum(yp ** 2) - inter + _EPSILON)
    return 1.0 - jnp.mean(iou)


if __name__ == "__main__":
    key = jax.random.PRNGKey(0)
    k1, k2 = jax.random.split(key)

    N, C, H, W = 2, 4, 16, 16
    y_pred = jax.random.normal(k1, (N, C, H, W), dtype=jnp.float32)
    y_true = (jax.random.uniform(k2, (N, C, H, W)) > 0.5).astype(jnp.float32)

    loss = iou_loss(y_pred, y_true)
    jax.block_until_ready(loss)

    ref = _iou_loss_ref(y_pred, y_true)
    assert jnp.allclose(loss, ref, atol=1e-5, rtol=1e-5), (loss, ref)

    print("KERNEL_OK")
</pallas_src>

<mosaic_0001>
module attributes {stable_mosaic.version = 11 : i64} {
  func.func @_iou_rows_kernel(%arg0: i32, %arg1: i32, %arg2: memref<8x256xf32, #tpu.memory_space<vmem>>, %arg3: memref<8x256xf32, #tpu.memory_space<vmem>>, %arg4: memref<8x1xf32, #tpu.memory_space<vmem>>, %arg5: memref<8x1xf32, #tpu.memory_space<vmem>>, %arg6: memref<8x1xf32, #tpu.memory_space<vmem>>, %arg7: memref<8x1xf32, #tpu.memory_space<vmem>>) attributes {dimension_semantics = [#tpu.dimension_semantics<parallel>, #tpu.dimension_semantics<arbitrary>], iteration_bounds = array<i64: 1, 1>, scalar_prefetch = 0 : i64, scratch_operands = 3 : i64, tpu.core_type = #tpu.core_type<tc>, window_params = [{transform_indices = @transform_0, window_bounds = array<i64: 8, 256>}, {transform_indices = @transform_1, window_bounds = array<i64: 8, 256>}, {transform_indices = @transform_2, window_bounds = array<i64: 8, 1>}]} {
    %c0_i32 = arith.constant 0 : i32
    %0 = arith.cmpi eq, %arg1, %c0_i32 : i32
    %1 = arith.extui %0 : i1 to i32
    %c0_i32_0 = arith.constant 0 : i32
    %2 = arith.cmpi ne, %1, %c0_i32_0 : i32
    scf.if %2 {
      %cst_21 = arith.constant 0.000000e+00 : f32
      %31 = vector.broadcast %cst_21 : f32 to vector<8x1xf32>
      %c0_22 = arith.constant 0 : index
      %c0_23 = arith.constant 0 : index
      %32 = vector.load %arg5[%c0_22, %c0_23] : memref<8x1xf32, #tpu.memory_space<vmem>>, vector<8x1xf32>
      tpu.vector_store %arg5[%c0_22, %c0_23], %31 {strides = array<i32>} : memref<8x1xf32, #tpu.memory_space<vmem>>, vector<8x1xf32>,
      %cst_24 = arith.constant 0.000000e+00 : f32
      %33 = vector.broadcast %cst_24 : f32 to vector<8x1xf32>
      %c0_25 = arith.constant 0 : index
      %c0_26 = arith.constant 0 : index
      %34 = vector.load %arg6[%c0_25, %c0_26] : memref<8x1xf32, #tpu.memory_space<vmem>>, vector<8x1xf32>
      tpu.vector_store %arg6[%c0_25, %c0_26], %33 {strides = array<i32>} : memref<8x1xf32, #tpu.memory_space<vmem>>, vector<8x1xf32>,
      %cst_27 = arith.constant 0.000000e+00 : f32
      %35 = vector.broadcast %cst_27 : f32 to vector<8x1xf32>
      %c0_28 = arith.constant 0 : index
      %c0_29 = arith.constant 0 : index
      %36 = vector.load %arg7[%c0_28, %c0_29] : memref<8x1xf32, #tpu.memory_space<vmem>>, vector<8x1xf32>
      tpu.vector_store %arg7[%c0_28, %c0_29], %35 {strides = array<i32>} : memref<8x1xf32, #tpu.memory_space<vmem>>, vector<8x1xf32>,
    } else {
    }
    %c0 = arith.constant 0 : index
    %c0_1 = arith.constant 0 : index
    %3 = vector.load %arg2[%c0, %c0_1] : memref<8x256xf32, #tpu.memory_space<vmem>>, vector<8x256xf32>
    %4 = arith.negf %3 : vector<8x256xf32>
    %5 = math.exp %4 : vector<8x256xf32>
    %cst = arith.constant 1.000000e+00 : f32
    %6 = vector.broadcast %cst : f32 to vector<8x256xf32>
    %7 = arith.addf %6, %5 : vector<8x256xf32>
    %8 = arith.divf %6, %7 : vector<8x256xf32>
    %c0_2 = arith.constant 0 : index
    %c0_3 = arith.constant 0 : index
    %9 = vector.load %arg3[%c0_2, %c0_3] : memref<8x256xf32, #tpu.memory_space<vmem>>, vector<8x256xf32>
    %c0_4 = arith.constant 0 : index
    %c0_5 = arith.constant 0 : index
    %10 = vector.load %arg5[%c0_4, %c0_5] : memref<8x1xf32, #tpu.memory_space<vmem>>, vector<8x1xf32>
    %11 = arith.mulf %9, %8 : vector<8x256xf32>
    %cst_6 = arith.constant dense<0.000000e+00> : vector<8xf32>
    %12 = vector.multi_reduction <add>, %11, %cst_6 [1] : vector<8x256xf32> to vector<8xf32>
    %13 = vector.shape_cast %12 : vector<8xf32> to vector<8x1xf32>
    %14 = arith.addf %10, %13 : vector<8x1xf32>
    %c0_7 = arith.constant 0 : index
    %c0_8 = arith.constant 0 : index
    %15 = vector.load %arg5[%c0_7, %c0_8] : memref<8x1xf32, #tpu.memory_space<vmem>>, vector<8x1xf32>
    tpu.vector_store %arg5[%c0_7, %c0_8], %14 {strides = array<i32>} : memref<8x1xf32, #tpu.memory_space<vmem>>, vector<8x1xf32>,
    %c0_9 = arith.constant 0 : index
    %c0_10 = arith.constant 0 : index
    %16 = vector.load %arg6[%c0_9, %c0_10] : memref<8x1xf32, #tpu.memory_space<vmem>>, vector<8x1xf32>
    %17 = arith.mulf %9, %9 : vector<8x256xf32>
    %cst_11 = arith.constant dense<0.000000e+00> : vector<8xf32>
    %18 = vector.multi_reduction <add>, %17, %cst_11 [1] : vector<8x256xf32> to vector<8xf32>
    %19 = vector.shape_cast %18 : vector<8xf32> to vector<8x1xf32>
    %20 = arith.addf %16, %19 : vector<8x1xf32>
    %c0_12 = arith.constant 0 : index
    %c0_13 = arith.constant 0 : index
    %21 = vector.load %arg6[%c0_12, %c0_13] : memref<8x1xf32, #tpu.memory_space<vmem>>, vector<8x1xf32>
    tpu.vector_store %arg6[%c0_12, %c0_13], %20 {strides = array<i32>} : memref<8x1xf32, #tpu.memory_space<vmem>>, vector<8x1xf32>,
    %c0_14 = arith.constant 0 : index
    %c0_15 = arith.constant 0 : index
    %22 = vector.load %arg7[%c0_14, %c0_15] : memref<8x1xf32, #tpu.memory_space<vmem>>, vector<8x1xf32>
    %23 = arith.mulf %8, %8 : vector<8x256xf32>
    %cst_16 = arith.constant dense<0.000000e+00> : vector<8xf32>
    %24 = vector.multi_reduction <add>, %23, %cst_16 [1] : vector<8x256xf32> to vector<8xf32>
    %25 = vector.shape_cast %24 : vector<8xf32> to vector<8x1xf32>
    %26 = arith.addf %22, %25 : vector<8x1xf32>
    %c0_17 = arith.constant 0 : index
    %c0_18 = arith.constant 0 : index
    %27 = vector.load %arg7[%c0_17, %c0_18] : memref<8x1xf32, #tpu.memory_space<vmem>>, vector<8x1xf32>
    tpu.vector_store %arg7[%c0_17, %c0_18], %26 {strides = array<i32>} : memref<8x1xf32, #tpu.memory_space<vmem>>, vector<8x1xf32>,
    %c0_i32_19 = arith.constant 0 : i32
    %28 = arith.cmpi eq, %arg1, %c0_i32_19 : i32
    %29 = arith.extui %28 : i1 to i32
    %c0_i32_20 = arith.constant 0 : i32
    %30 = arith.cmpi ne, %29, %c0_i32_20 : i32
    scf.if %30 {
      %c0_21 = arith.constant 0 : index
      %c0_22 = arith.constant 0 : index
      %31 = vector.load %arg5[%c0_21, %c0_22] : memref<8x1xf32, #tpu.memory_space<vmem>>, vector<8x1xf32>
      %cst_23 = arith.constant 9.99999997E-7 : f32
      %32 = vector.broadcast %cst_23 : f32 to vector<8x1xf32>
      %33 = arith.addf %31, %32 : vector<8x1xf32>
      %c0_24 = arith.constant 0 : index
      %c0_25 = arith.constant 0 : index
      %34 = vector.load %arg6[%c0_24, %c0_25] : memref<8x1xf32, #tpu.memory_space<vmem>>, vector<8x1xf32>
      %c0_26 = arith.constant 0 : index
      %c0_27 = arith.constant 0 : index
      %35 = vector.load %arg7[%c0_26, %c0_27] : memref<8x1xf32, #tpu.memory_space<vmem>>, vector<8x1xf32>
      %36 = arith.addf %34, %35 : vector<8x1xf32>
      %37 = arith.subf %36, %31 : vector<8x1xf32>
      %cst_28 = arith.constant 9.99999997E-7 : f32
      %38 = vector.broadcast %cst_28 : f32 to vector<8x1xf32>
      %39 = arith.addf %37, %38 : vector<8x1xf32>
      %40 = arith.divf %33, %39 : vector<8x1xf32>
      %c0_29 = arith.constant 0 : index
      %c0_30 = arith.constant 0 : index
      %41 = vector.load %arg4[%c0_29, %c0_30] : memref<8x1xf32, #tpu.memory_space<vmem>>, vector<8x1xf32>
      tpu.vector_store %arg4[%c0_29, %c0_30], %40 {strides = array<i32>} : memref<8x1xf32, #tpu.memory_space<vmem>>, vector<8x1xf32>,
    } else {
    }
    return
  }
  func.func @transform_0(%arg0: i32, %arg1: i32) -> (i32, i32) {
    %c0_i32 = arith.constant 0 : i32
    return %arg0, %arg1 : i32, i32
  }
  func.func @transform_1(%arg0: i32, %arg1: i32) -> (i32, i32) {
    %c0_i32 = arith.constant 0 : i32
    return %arg0, %arg1 : i32, i32
  }
  func.func @transform_2(%arg0: i32, %arg1: i32) -> (i32, i32) {
    %c0_i32 = arith.constant 0 : i32
    %c0_i32_0 = arith.constant 0 : i32
    return %arg0, %c0_i32 : i32, i32
  }
}

</mosaic_0001>

<bundles_post_ra>
// kernel: tpu_custom_call.1
= control target key start
LH: loop header
LB: loop body
LE: loop exit
PB: predicated region body
PF: predicated region fallthrough
CT: control target
= control target key end

     0   :  { %7 = vsyncpa [#allocation6], 0  ;;  %s196_s0 = inlined_call_operand.hbm [shape: f32[8,256], index: 0, kind: input, shape index: {}]   ;;  %s197_s1 = inlined_call_operand.hbm [shape: f32[8,256], index: 1, kind: input, shape index: {}]   ;;  %s198_s2 = inlined_call_operand.vmem [shape: f32[8,1], index: 2, kind: output, shape index: {}]  }
   0x1   :  { %8 = vsyncpa [#allocation8], 0  ;;  %s162_s9 = smov [#allocation5]   ;;  %s163_s11 = smov [#allocation7]  }
   0x2   :  { %s15_s10 = sshll.u32 %s162_s9, 4  ;;  %s25_s12 = sshll.u32 %s163_s11, 4  ;;  %s16_s10 = int_to_ptr.vmem [resolvable:$true] %s15_s10  ;;  %s26_s12 = int_to_ptr.vmem [resolvable:$true] %s25_s12 }
   0x3   :  { %s126_s13 = scalar_lea.vmem %s16_s10, 256  ;;  %p131_p1 = scmp.lt.s32.totalorder %s16_s10, %s16_s10 }
   0x4   :  { %p127_p0 = scmp.ne.s32.totalorder %s16_s10, %s126_s13  ;;  %p132_p2 = scmp.lt.s32.totalorder %s126_s13, %s126_s13 }
   0x6   :  { %p133_p3 = por %p132_p2, %p131_p1 }
   0x8   :  { %p134_p4 = pnand %p133_p3, %p127_p0 }
   0xa   :  { %137 = shalt.err (!%p134_p4)
}
   0xb   :  { %18 = dma.hbm_to_vmem [thread:$0]  %s196_s0, 256, %s16_s10, [#allocation6]  }
   0xc   :  { %s146_s16 = scalar_lea.vmem %s26_s12, 256  ;;  %p151_p6 = scmp.lt.s32.totalorder %s26_s12, %s26_s12 }
   0xd   :  { %p147_p5 = scmp.ne.s32.totalorder %s26_s12, %s146_s16  ;;  %p152_p7 = scmp.lt.s32.totalorder %s146_s16, %s146_s16 }
   0xf   :  { %p153_p8 = por %p152_p7, %p151_p6 }
  0x11   :  { %p154_p9 = pnand %p153_p8, %p147_p5 }
  0x13   :  { %157 = shalt.err (!%p154_p9)
}
  0x14   :  { %28 = dma.hbm_to_vmem [thread:$0]  %s197_s1, 256, %s26_s12, [#allocation8]  }
  0x15   :  { %158 = dma.done.wait [#allocation6], 256  }
  0x16   :  { %159 = vsyncadd [#allocation6], 4294967040 }
  0x17   :  { %160 = dma.done.wait [#allocation8], 256  }
  0x18   :  { %161 = vsyncadd [#allocation8], 4294967040  ;;  %vm39_vm0 = vcmask 7168   ;;  %v164_v0 = vmov 0.0   ;;  %v57_v1 = vld [vmem:[#allocation7] sm:$0xff]  ;;  %v58_v2 = vld [vmem:[#allocation7 + $0x8] sm:$0xff] }
  0x19   :  { %41 = vst.msk [vmem:[#allocation3] sm:$0xff] %vm39_vm0, %v164_v0  ;;  %40 = vst.msk [vmem:[#allocation2] sm:$0xff] %vm39_vm0, %v164_v0  ;;  %v43_v3 = vld [vmem:[#allocation5] sm:$0xff]  ;;  %v69_v4 = vmul.f32 %v57_v1, %v57_v1  ;;  %v70_v5 = vmul.f32 %v58_v2, %v58_v2  ;;  %v44_v6 = vld [vmem:[#allocation5 + $0x8] sm:$0xff] }
  0x1a   :  { %42 = vst.msk [vmem:[#allocation4] sm:$0xff] %vm39_vm0, %v164_v0  ;;  %v103_v7 = vmul.f32 -1.442695, %v43_v3  ;;  %v104_v8 = vmul.f32 -1.442695, %v44_v6 }
  0x1b   :  { %v71_v9 = vadd.f32 %v70_v5, %v69_v4 }
  0x1c   :  { %108 = vpow2.f32 %v103_v7 }
  0x1d   :  { %110 = vpow2.f32 %v104_v8  ;;  %72 = vadd.xlane.f32.xlu0 %v71_v9 }
  0x20   :  { %v68_v22 = vld [vmem:[#allocation3] sm:$0xff]  ;;  %v59_v26 = vld [vmem:[#allocation2] sm:$0xff] }
  0x21   :  { %v76_v25 = vld [vmem:[#allocation4] sm:$0xff] }
  0x29   :  { %v109_v10 = vpop.eup %108 }
  0x2a   :  { %v111_v11 = vpop.eup %110  ;;  %v51_v12 = vadd.f32 1.0, %v109_v10 }
  0x2b   :  { %v52_v13 = vadd.f32 1.0, %v111_v11 }
  0x2c   :  { %112 = vrcp.f32 %v51_v12 }
  0x2d   :  { %114 = vrcp.f32 %v52_v13 }
  0x39   :  { %v113_v14 = vpop.eup %112 }
  0x3a   :  { %v115_v15 = vpop.eup %114  ;;  %v77_v16 = vmul.f32 %v113_v14, %v113_v14  ;;  %v60_v17 = vmul.f32 %v113_v14, %v57_v1 }
  0x3b   :  { %v78_v18 = vmul.f32 %v115_v15, %v115_v15  ;;  %v61_v19 = vmul.f32 %v115_v15, %v58_v2 }
  0x3d   :  { %v79_v20 = vadd.f32 %v78_v18, %v77_v16  ;;  %v62_v21 = vadd.f32 %v61_v19, %v60_v17 }
  0x3f   :  { %80 = vadd.xlane.f32.xlu0 %v79_v20  ;;  %63 = vadd.xlane.f32.xlu1 %v62_v21 }
  0xa6   :  { %v73_v23 = vpop.xlane.xlu0 %72 }
  0xa7   :  { %v74_v24 = vadd.f32 %v73_v23, %v68_v22 }
  0xa9   :  { %75 = vst.msk [vmem:[#allocation3] sm:$0xff] %vm39_vm0, %v74_v24 }
  0xb0   :  { %v89_v31 = vld [vmem:[#allocation3] sm:$0xff] }
  0xc8   :  { %v81_v27 = vpop.xlane.xlu0 %80  ;;  %v64_v28 = vpop.xlane.xlu1 %63 }
  0xc9   :  { %v82_v29 = vadd.f32 %v81_v27, %v76_v25  ;;  %v65_v30 = vadd.f32 %v64_v28, %v59_v26 }
  0xcb   :  { %83 = vst.msk [vmem:[#allocation4] sm:$0xff] %vm39_vm0, %v82_v29  ;;  %67 = vst.msk [vmem:[#allocation2] sm:$0xff] %vm39_vm0, %v65_v30 }
  0xd2   :  { %v90_v32 = vld [vmem:[#allocation4] sm:$0xff]  ;;  %v87_v33 = vld [vmem:[#allocation2] sm:$0xff] }
  0xd3   :  { %v91_v34 = vadd.f32 %v90_v32, %v89_v31  ;;  %v88_v37 = vadd.f32 1e-06, %v87_v33 }
  0xd5   :  { %v92_v35 = vsub.f32 %v91_v34, %v87_v33 }
  0xd7   :  { %v93_v36 = vadd.f32 1e-06, %v92_v35 }
  0xd9   :  { %116 = vrcp.f32 %v93_v36 }
  0xe6   :  { %v117_v38 = vpop.eup %116 }
  0xe7   :  { %v95_v39 = vmul.f32 %v117_v38, %v88_v37 }
  0xe9   :  { %96 = vst.msk [vmem:[%s198_s2] sm:$0xff] %vm39_vm0, %v95_v39 }
  0xea   :  { %101 = vsyncpa [#allocation6], 1 }
  0xeb   :  { %102 = vsyncpa [#allocation8], 1 }

</bundles_post_ra>
